<compile_context>
chip_gen: v7x
topology: tpu7x:2x2x1
jax: 0.10.0
libtpu: 0.0.40
codegen_flags: <defaults>
</compile_context>

<pallas_src>
import functools

import jax
import jax.numpy as jnp
from jax.experimental import pallas as pl
from jax.experimental.pallas import tpu as pltpu


def _round_up(x, m):
    return ((x + m - 1) // m) * m


def _vmem_limit_bytes():
    """Per-generation scoped-VMEM cap (v5e/v6e: 128 MiB physical, v7x: 64 MiB)."""
    try:
        kind = jax.devices()[0].device_kind.lower()
    except Exception:
        kind = ""
    if "v5" in kind or "v6" in kind:
        return 100 * 1024 * 1024
    return 48 * 1024 * 1024  # v7x / unknown: stay well under 64 MiB per-TC VMEM


_VMEM_LIMIT = _vmem_limit_bytes()


def _choose_tm(M, K, Cout, out_itemsize):
    """M-tile: as large as the VMEM budget allows, multiple of 16, but leaving
    at least 2 grid steps so the 'parallel' axis can use both v7x TensorCores."""
    # double-buffered per-row bytes: bf16 patches + bf16 residual + output tile
    per_row = 2 * (2 * K + 2 * Cout + out_itemsize * Cout)
    budget = int(_VMEM_LIMIT * 0.75)
    tm = budget // max(per_row, 1)
    tm = max(16, min(2048, tm))
    if M > 32:
        tm = min(tm, _round_up(pl.cdiv(M, 2), 16))
    tm = (tm // 16) * 16
    if tm >= M:
        return M, 1          # single full-extent block (no divisibility issue)
    return tm, pl.cdiv(M, tm)  # ragged last tile handled by Pallas


# ---------------------------------------------------------------------------
# Pallas kernels: fused im2col-matmul (BN scale pre-folded into W) + bias
#                 [+ residual] + ReLU
# ---------------------------------------------------------------------------
def _conv_bn_relu_kernel(p_ref, w_ref, bias_ref, o_ref):
    # p_ref: (TM, K) bf16, w_ref: (K, Cout) bf16, bias_ref: (1, Cout) f32
    y = jnp.dot(p_ref[...], w_ref[...], preferred_element_type=jnp.float32)
    y = y + bias_ref[...]
    o_ref[...] = jnp.maximum(y, 0.0).astype(o_ref.dtype)


def _conv_bn_res_relu_kernel(p_ref, w_ref, bias_ref, res_ref, o_ref):
    # same plus residual add (res_ref: (TM, Cout) bf16, upcast in-kernel)
    y = jnp.dot(p_ref[...], w_ref[...], preferred_element_type=jnp.float32)
    y = y + bias_ref[...] + res_ref[...].astype(jnp.float32)
    o_ref[...] = jnp.maximum(y, 0.0).astype(o_ref.dtype)


def fused_stage(patches, w_folded, bias, residual=None, out_dtype=jnp.float32):
    """relu(patches @ w_folded + bias [+ residual]) -> (M, Cout) in out_dtype.

    patches:  (M, K)      bf16 im2col rows
    w_folded: (K, Cout)   bf16 conv weight with BN scale folded in
    bias:     (1, Cout)   f32 folded BN bias
    residual: optional (M, Cout) bf16 shortcut
    """
    M, K = patches.shape
    Cout = w_folded.shape[1]
    out_itemsize = jnp.dtype(out_dtype).itemsize
    TM, grid = _choose_tm(M, K, Cout, out_itemsize)

    in_specs = [
        pl.BlockSpec((TM, K), lambda i: (i, 0)),     # streaming patch rows
        pl.BlockSpec((K, Cout), lambda i: (0, 0)),   # resident weight
        pl.BlockSpec((1, Cout), lambda i: (0, 0)),   # resident bias
    ]
    args = [patches, w_folded, bias]
    bytes_accessed = (M * K * 2 + K * Cout * 2 + Cout * 4
                      + M * Cout * out_itemsize)
    if residual is not None:
        in_specs.append(pl.BlockSpec((TM, Cout), lambda i: (i, 0)))
        args.append(residual)
        bytes_accessed += M * Cout * 2
        kernel = _conv_bn_res_relu_kernel
    else:
        kernel = _conv_bn_relu_kernel

    return pl.pallas_call(
        kernel,
        out_shape=jax.ShapeDtypeStruct((M, Cout), out_dtype),
        grid_spec=pltpu.PrefetchScalarGridSpec(
            num_scalar_prefetch=0,
            grid=(grid,),
            in_specs=in_specs,
            out_specs=pl.BlockSpec((TM, Cout), lambda i: (i, 0)),
        ),
        compiler_params=pltpu.CompilerParams(
            dimension_semantics=("parallel",),
            vmem_limit_bytes=_VMEM_LIMIT,
        ),
        cost_estimate=pl.CostEstimate(
            flops=2 * M * K * Cout,
            transcendentals=0,
            bytes_accessed=bytes_accessed,
        ),
    )(*args)


# ---------------------------------------------------------------------------
# Glue: im2col, BN folding, shortcut (IdentityPadding), parameter init
# ---------------------------------------------------------------------------
def im2col_3x3(x_nhwc, stride):
    """3x3 / padding=1 im2col; (N*Ho*Wo, 9*C) with (ky,kx,c) ordering.
    Preserves dtype (pass bf16 to keep patch traffic in bf16)."""
    N, H, W, C = x_nhwc.shape
    Ho = (H - 1) // stride + 1
    Wo = (W - 1) // stride + 1
    xp = jnp.pad(x_nhwc, ((0, 0), (1, 1), (1, 1), (0, 0)))
    cols = []
    for ky in range(3):
        for kx in range(3):
            sl = xp[:, ky:ky + stride * (Ho - 1) + 1:stride,
                       kx:kx + stride * (Wo - 1) + 1:stride, :]
            cols.append(sl)
    patches = jnp.concatenate(cols, axis=-1)  # (N, Ho, Wo, 9*C)
    return patches.reshape(N * Ho * Wo, 9 * C), (N, Ho, Wo)


def fold_bn(gamma, beta, mean, var, eps=1e-5):
    scale = gamma / jnp.sqrt(var + eps)
    bias = beta - mean * scale
    return scale[None, :].astype(jnp.float32), bias[None, :].astype(jnp.float32)


def conv_w_to_matmul(w_oihw):
    """(Cout, Cin, 3, 3) -> (9*Cin, Cout) matching (ky,kx,c) patch ordering."""
    cout, cin = w_oihw.shape[0], w_oihw.shape[1]
    return jnp.transpose(w_oihw, (2, 3, 1, 0)).reshape(9 * cin, cout)


@functools.partial(jax.jit, static_argnames=("stride", "down_sample"))
def residual_block_forward(x_nchw, params, stride=1, down_sample=False):
    Cin = x_nchw.shape[1]
    Cout = params["conv1_w"].shape[0]
    if not down_sample:
        assert stride == 1 and Cin == Cout, \
            "identity shortcut requires stride=1 and in_channels==out_channels"

    # TODO(synk): when chaining blocks, keep activations NHWC end-to-end to
    # drop these boundary transposes (extra HBM passes per block).
    x = jnp.transpose(x_nchw, (0, 2, 3, 1)).astype(jnp.bfloat16)  # NHWC bf16

    s1, b1 = fold_bn(params["bn1_gamma"], params["bn1_beta"],
                     params["bn1_mean"], params["bn1_var"])
    s2, b2 = fold_bn(params["bn2_gamma"], params["bn2_beta"],
                     params["bn2_mean"], params["bn2_var"])
    # fold BN scale into the matmul weights: (P @ W) * s == P @ (W * s)
    w1m = (conv_w_to_matmul(params["conv1_w"]) * s1).astype(jnp.bfloat16)
    w2m = (conv_w_to_matmul(params["conv2_w"]) * s2).astype(jnp.bfloat16)

    # stage 1: relu(bn1(conv1(x)))        (dropout = identity, eval mode)
    p1, (N_, Ho, Wo) = im2col_3x3(x, stride)
    out1 = fused_stage(p1, w1m, b1, out_dtype=jnp.bfloat16)   # bf16, feeds stage 2

    # stage 2: relu(bn2(conv2(out1)) + shortcut)
    p2, _ = im2col_3x3(out1.reshape(N_, Ho, Wo, Cout), 1)
    if down_sample:
        # IdentityPadding: zero-pad channels to Cout, then MaxPool2d(1, stride)
        sc = jnp.pad(x, ((0, 0), (0, 0), (0, 0), (0, Cout - Cin)))
        sc = sc[:, ::stride, ::stride, :]
    else:
        sc = x
    sc_flat = sc.reshape(N_ * Ho * Wo, Cout)                  # bf16 residual
    out2 = fused_stage(p2, w2m, b2, residual=sc_flat, out_dtype=jnp.float32)

    out = out2.reshape(N_, Ho, Wo, Cout)
    return jnp.transpose(out, (0, 3, 1, 2))  # back to NCHW


def init_params(key, in_channels, out_channels):
    ks = jax.random.split(key, 8)
    return {
        "conv1_w": 0.1 * jax.random.normal(ks[0], (out_channels, in_channels, 3, 3), jnp.float32),
        "conv2_w": 0.1 * jax.random.normal(ks[1], (out_channels, out_channels, 3, 3), jnp.float32),
        "bn1_gamma": 1.0 + 0.1 * jax.random.normal(ks[2], (out_channels,), jnp.float32),
        "bn1_beta": 0.1 * jax.random.normal(ks[3], (out_channels,), jnp.float32),
        "bn1_mean": 0.1 * jax.random.normal(ks[4], (out_channels,), jnp.float32),
        "bn1_var": jax.random.uniform(ks[5], (out_channels,), jnp.float32, 0.5, 1.5),
        "bn2_gamma": 1.0 + 0.1 * jax.random.normal(ks[6], (out_channels,), jnp.float32),
        "bn2_beta": 0.1 * jax.random.normal(ks[7], (out_channels,), jnp.float32),
        "bn2_mean": jnp.zeros((out_channels,), jnp.float32),
        "bn2_var": jnp.ones((out_channels,), jnp.float32),
    }


# ---------------------------------------------------------------------------
# Pure-JAX reference (lax.conv, f32) for correctness check
# ---------------------------------------------------------------------------
def ref_forward(x, params, stride, down_sample, eps=1e-5):
    def conv(z, w, s):
        return jax.lax.conv_general_dilated(
            z, w, (s, s), ((1, 1), (1, 1)),
            dimension_numbers=("NCHW", "OIHW", "NCHW"),
            precision=jax.lax.Precision.HIGHEST)

    def bn(y, g, b, m, v):
        return (g[None, :, None, None] * (y - m[None, :, None, None])
                / jnp.sqrt(v[None, :, None, None] + eps) + b[None, :, None, None])

    out = jax.nn.relu(bn(conv(x, params["conv1_w"], stride),
                         params["bn1_gamma"], params["bn1_beta"],
                         params["bn1_mean"], params["bn1_var"]))
    out = bn(conv(out, params["conv2_w"], 1),
             params["bn2_gamma"], params["bn2_beta"],
             params["bn2_mean"], params["bn2_var"])
    if down_sample:
        Cout, Cin = params["conv1_w"].shape[0], x.shape[1]
        sc = jnp.pad(x, ((0, 0), (0, Cout - Cin), (0, 0), (0, 0)))
        sc = sc[:, :, ::stride, ::stride]
    else:
        sc = x
    return jax.nn.relu(out + sc)


if __name__ == "__main__":
    key = jax.random.PRNGKey(0)
    kx, kp1, kp2 = jax.random.split(key, 3)

    # bf16 patches/weights/residual (f32 accumulation) vs f32 reference.
    ATOL = RTOL = 4e-2

    # config A: stride=1, no downsample (identity shortcut)
    x = jax.random.normal(kx, (2, 4, 16, 16), jnp.float32)
    params_a = init_params(kp1, in_channels=4, out_channels=4)
    out_a = residual_block_forward(x, params_a, stride=1, down_sample=False)
    jax.block_until_ready(out_a)
    ref_a = ref_forward(x, params_a, 1, False)
    assert out_a.shape == (2, 4, 16, 16)
    assert jnp.allclose(out_a, ref_a, atol=ATOL, rtol=RTOL), "config A mismatch"

    # config B: stride=2, down_sample=True (IdentityPadding shortcut)
    params_b = init_params(kp2, in_channels=4, out_channels=8)
    out_b = residual_block_forward(x, params_b, stride=2, down_sample=True)
    jax.block_until_ready(out_b)
    ref_b = ref_forward(x, params_b, 2, True)
    assert out_b.shape == (2, 8, 8, 8)
    assert jnp.allclose(out_b, ref_b, atol=ATOL, rtol=RTOL), "config B mismatch"

    print("KERNEL_OK")
</pallas_src>

<mosaic_0001>
module attributes {stable_mosaic.version = 11 : i64} {
  func.func @_conv_bn_relu_kernel(%arg0: i32, %arg1: memref<256x36xbf16, #tpu.memory_space<vmem>>, %arg2: memref<36x4xbf16, #tpu.memory_space<vmem>>, %arg3: memref<1x4xf32, #tpu.memory_space<vmem>>, %arg4: memref<256x4xbf16, #tpu.memory_space<vmem>>) attributes {dimension_semantics = [#tpu.dimension_semantics<parallel>], iteration_bounds = array<i64: 2>, scalar_prefetch = 0 : i64, scratch_operands = 0 : i64, tpu.core_type = #tpu.core_type<tc>, window_params = [{transform_indices = @transform_0, window_bounds = array<i64: 256, 36>}, {pipeline_mode = #tpu.pipeline_mode<synchronous>, transform_indices = @transform_1, window_bounds = array<i64: 36, 4>}, {pipeline_mode = #tpu.pipeline_mode<synchronous>, transform_indices = @transform_2, window_bounds = array<i64: 1, 4>}, {transform_indices = @transform_3, window_bounds = array<i64: 256, 4>}]} {
    %c0 = arith.constant 0 : index
    %c0_0 = arith.constant 0 : index
    %0 = vector.load %arg1[%c0, %c0_0] : memref<256x36xbf16, #tpu.memory_space<vmem>>, vector<256x36xbf16>
    %c0_1 = arith.constant 0 : index
    %c0_2 = arith.constant 0 : index
    %1 = vector.load %arg2[%c0_1, %c0_2] : memref<36x4xbf16, #tpu.memory_space<vmem>>, vector<36x4xbf16>
    %cst = arith.constant dense<0.000000e+00> : vector<256x4xf32>
    %2 = tpu.matmul %0, %1, %cst {dimension_numbers = #tpu.dot_dimension_numbers<[1], [0], [0], [1], [0, 0, 1, 1], [], []>} : vector<256x36xbf16>, vector<36x4xbf16>, vector<256x4xf32> -> vector<256x4xf32>
    %c0_3 = arith.constant 0 : index
    %c0_4 = arith.constant 0 : index
    %3 = vector.load %arg3[%c0_3, %c0_4] : memref<1x4xf32, #tpu.memory_space<vmem>>, vector<1x4xf32>
    %4 = vector.broadcast %3 : vector<1x4xf32> to vector<256x4xf32>
    %5 = arith.addf %2, %4 : vector<256x4xf32>
    %cst_5 = arith.constant 0.000000e+00 : f32
    %6 = vector.broadcast %cst_5 : f32 to vector<256x4xf32>
    %7 = arith.maximumf %5, %6 : vector<256x4xf32>
    %8 = arith.truncf %7 : vector<256x4xf32> to vector<256x4xbf16>
    %c0_6 = arith.constant 0 : index
    %c0_7 = arith.constant 0 : index
    %9 = vector.load %arg4[%c0_6, %c0_7] : memref<256x4xbf16, #tpu.memory_space<vmem>>, vector<256x4xbf16>
    tpu.vector_store %arg4[%c0_6, %c0_7], %8 {strides = array<i32>} : memref<256x4xbf16, #tpu.memory_space<vmem>>, vector<256x4xbf16>,
    return
  }
  func.func @transform_0(%arg0: i32) -> (i32, i32) {
    %c0_i32 = arith.constant 0 : i32
    %c0_i32_0 = arith.constant 0 : i32
    return %arg0, %c0_i32 : i32, i32
  }
  func.func @transform_1(%arg0: i32) -> (i32, i32) {
    %c0_i32 = arith.constant 0 : i32
    %c0_i32_0 = arith.constant 0 : i32
    %c0_i32_1 = arith.constant 0 : i32
    return %c0_i32, %c0_i32_0 : i32, i32
  }
  func.func @transform_2(%arg0: i32) -> (i32, i32) {
    %c0_i32 = arith.constant 0 : i32
    %c0_i32_0 = arith.constant 0 : i32
    %c0_i32_1 = arith.constant 0 : i32
    return %c0_i32, %c0_i32_0 : i32, i32
  }
  func.func @transform_3(%arg0: i32) -> (i32, i32) {
    %c0_i32 = arith.constant 0 : i32
    %c0_i32_0 = arith.constant 0 : i32
    return %arg0, %c0_i32 : i32, i32
  }
}

module attributes {stable_mosaic.version = 11 : i64} {
  func.func @_conv_bn_res_relu_kernel(%arg0: i32, %arg1: memref<256x36xbf16, #tpu.memory_space<vmem>>, %arg2: memref<36x4xbf16, #tpu.memory_space<vmem>>, %arg3: memref<1x4xf32, #tpu.memory_space<vmem>>, %arg4: memref<256x4xbf16, #tpu.memory_space<vmem>>, %arg5: memref<256x4xf32, #tpu.memory_space<vmem>>) attributes {dimension_semantics = [#tpu.dimension_semantics<parallel>], iteration_bounds = array<i64: 2>, scalar_prefetch = 0 : i64, scratch_operands = 0 : i64, tpu.core_type = #tpu.core_type<tc>, window_params = [{transform_indices = @transform_0, window_bounds = array<i64: 256, 36>}, {pipeline_mode = #tpu.pipeline_mode<synchronous>, transform_indices = @transform_1, window_bounds = array<i64: 36, 4>}, {pipeline_mode = #tpu.pipeline_mode<synchronous>, transform_indices = @transform_2, window_bounds = array<i64: 1, 4>}, {transform_indices = @transform_3, window_bounds = array<i64: 256, 4>}, {transform_indices = @transform_4, window_bounds = array<i64: 256, 4>}]} {
    %c0 = arith.constant 0 : index
    %c0_0 = arith.constant 0 : index
    %0 = vector.load %arg1[%c0, %c0_0] : memref<256x36xbf16, #tpu.memory_space<vmem>>, vector<256x36xbf16>
    %c0_1 = arith.constant 0 : index
    %c0_2 = arith.constant 0 : index
    %1 = vector.load %arg2[%c0_1, %c0_2] : memref<36x4xbf16, #tpu.memory_space<vmem>>, vector<36x4xbf16>
    %cst = arith.constant dense<0.000000e+00> : vector<256x4xf32>
    %2 = tpu.matmul %0, %1, %cst {dimension_numbers = #tpu.dot_dimension_numbers<[1], [0], [0], [1], [0, 0, 1, 1], [], []>} : vector<256x36xbf16>, vector<36x4xbf16>, vector<256x4xf32> -> vector<256x4xf32>
    %c0_3 = arith.constant 0 : index
    %c0_4 = arith.constant 0 : index
    %3 = vector.load %arg3[%c0_3, %c0_4] : memref<1x4xf32, #tpu.memory_space<vmem>>, vector<1x4xf32>
    %4 = vector.broadcast %3 : vector<1x4xf32> to vector<256x4xf32>
    %5 = arith.addf %2, %4 : vector<256x4xf32>
    %c0_5 = arith.constant 0 : index
    %c0_6 = arith.constant 0 : index
    %6 = vector.load %arg4[%c0_5, %c0_6] : memref<256x4xbf16, #tpu.memory_space<vmem>>, vector<256x4xbf16>
    %7 = arith.extf %6 : vector<256x4xbf16> to vector<256x4xf32>
    %8 = arith.addf %5, %7 : vector<256x4xf32>
    %cst_7 = arith.constant 0.000000e+00 : f32
    %9 = vector.broadcast %cst_7 : f32 to vector<256x4xf32>
    %10 = arith.maximumf %8, %9 : vector<256x4xf32>
    %c0_8 = arith.constant 0 : index
    %c0_9 = arith.constant 0 : index
    %11 = vector.load %arg5[%c0_8, %c0_9] : memref<256x4xf32, #tpu.memory_space<vmem>>, vector<256x4xf32>
    tpu.vector_store %arg5[%c0_8, %c0_9], %10 {strides = array<i32>} : memref<256x4xf32, #tpu.memory_space<vmem>>, vector<256x4xf32>,
    return
  }
  func.func @transform_0(%arg0: i32) -> (i32, i32) {
    %c0_i32 = arith.constant 0 : i32
    %c0_i32_0 = arith.constant 0 : i32
    return %arg0, %c0_i32 : i32, i32
  }
  func.func @transform_1(%arg0: i32) -> (i32, i32) {
    %c0_i32 = arith.constant 0 : i32
    %c0_i32_0 = arith.constant 0 : i32
    %c0_i32_1 = arith.constant 0 : i32
    return %c0_i32, %c0_i32_0 : i32, i32
  }
  func.func @transform_2(%arg0: i32) -> (i32, i32) {
    %c0_i32 = arith.constant 0 : i32
    %c0_i32_0 = arith.constant 0 : i32
    %c0_i32_1 = arith.constant 0 : i32
    return %c0_i32, %c0_i32_0 : i32, i32
  }
  func.func @transform_3(%arg0: i32) -> (i32, i32) {
    %c0_i32 = arith.constant 0 : i32
    %c0_i32_0 = arith.constant 0 : i32
    return %arg0, %c0_i32 : i32, i32
  }
  func.func @transform_4(%arg0: i32) -> (i32, i32) {
    %c0_i32 = arith.constant 0 : i32
    %c0_i32_0 = arith.constant 0 : i32
    return %arg0, %c0_i32 : i32, i32
  }
}

</mosaic_0001>

<bundles_post_ra>
// kernel: residual_block_forward.2
= control target key start
LH: loop header
LB: loop body
LE: loop exit
PB: predicated region body
PF: predicated region fallthrough
CT: control target
= control target key end

     0   :  { %s1008_s12 = smov 0   ;;  %s1178_s0 = inlined_call_operand.vmem [shape: bf16[512,36], index: 0, kind: input, shape index: {}]   ;;  %s1179_s1 = inlined_call_operand.vmem [shape: bf16[36,4], index: 1, kind: input, shape index: {}]   ;;  %s1180_s2 = inlined_call_operand.vmem [shape: f32[1,4], index: 2, kind: input, shape index: {}]   ;;  %s1181_s3 = inlined_call_operand.vmem [shape: bf16[512,4], index: 3, kind: output, shape index: {}]  }
   0x1 LB: > { %s777_s13 = sadd.s32 4294967295, %s986_s12   ;;  %p781_p0 = scmp.ge.s32.totalorder %s986_s12, 1  ;;  %s986_s12 = sphi %s1008_s12, %s13_s12  }
   0x2   : > { %p138_p1 = scmp.lt.s32.totalorder %s986_s12, 3 }
   0x4   : > { %p139_p2 = pnand %p781_p0, %p138_p1 }
   0x5   : > { %v961_v0 = vld [vmem:[%s1179_s1] sm:$0xff] (!%p139_p2)   ;;  %v962_v1 = vld [vmem:[%s1179_s1 + $0x8] sm:$0xff] (!%p139_p2)   ;;  %s782_s18 = sshll.u32 (!%p139_p2), %s777_s13, 5  ;;  %v963_v2 = vld [vmem:[%s1179_s1 + $0x10] ss:$0 sps:$4 sm:$0x33] (!%p139_p2)  }
   0x6   : > { %142 = sbr.rel (%p139_p2) target bundleno = 265 (0x109), region = 32  ;;  %907 = vmatprep.subr.bf16.mxu0 (!%p139_p2), %v961_v0  ;;  %945 = vmatprep.subr.bf16.mxu1 (!%p139_p2), %v961_v0  ;;  %p163_p3 = scmp.lt.s32.totalorder (!%p139_p2), %s782_s18, 63  ;;  %vm363_vm0 = vcmask (!%p139_p2), 1041408   ;;  %vm314_vm1 = vcmask (!%p139_p2), 293888   ;;  %v1070_v20 = vld [vmem:[%s1180_s2] ss:$0 sm:$0xff] (!%p139_p2) }
   0x7   : > { %908 = vmatpush3.bf16.msra.mxu0 (!%p139_p2), %v961_v0  ;;  %948 = vmatpush3.bf16.msra.mxu1 (!%p139_p2), %v961_v0  ;;  %v365_v3 = vsel (!%p139_p2), %vm363_vm0, %v963_v2, 0  ;;  %vm688_vm2 = vcmask (!%p139_p2), 27648  }
   0x8   : > { %909 = vmatprep.subr.bf16.mxu0 (!%p139_p2), %v962_v1  ;;  %946 = vmatprep.subr.bf16.mxu1 (!%p139_p2), %v962_v1 }
   0xb   : > { %910 = vmatpush3.bf16.msra.mxu0 (!%p139_p2), %v962_v1  ;;  %949 = vmatpush3.bf16.msra.mxu1 (!%p139_p2), %v962_v1 }
   0xc   : > { %951 = vmatprep.subr.msk.bf16.mxu0 (!%p139_p2), %vm363_vm0, %v963_v2  ;;  %952 = vmatprep.subr.msk.bf16.mxu1 (!%p139_p2), %vm363_vm0, %v963_v2 }
   0xd   : > { %s1183_s18 = smov (!%p163_p3, %s782_s18), 63 }
   0xe   : > { %s783_s21 = sshll.u32 %s1183_s18, 2 }
   0xf   : > { %s1033_s24 = scalar_lea.vmem %s1178_s0, %s783_s21  ;;  %912 = vmatpush3.bf16.msra.mxu0 %v365_v3  ;;  %950 = vmatpush3.bf16.msra.mxu1 %v365_v3  ;;  %s1083_s29 = scalar_lea.vmem %s1181_s3, %s783_s21 }
  0x10   : > { %v964_v4 = vld [vmem:[%s1033_s24] sm:$0xff]   ;;  %v966_v6 = vld [vmem:[%s1033_s24 + $0x8] sm:$0xff]   ;;  %v968_v8 = vld [vmem:[%s1033_s24 + $0x10] sm:$0xff]  }
  0x11   : > { %v965_v5 = vld [vmem:[%s1033_s24 + $0x40] sm:$0xff]   ;;  %913 = vmatprep.mubr.msk.bf16.mxu0 %vm314_vm1, %v964_v4  ;;  %v967_v7 = vld [vmem:[%s1033_s24 + $0x48] sm:$0xff]   ;;  %v969_v9 = vld [vmem:[%s1033_s24 + $0x50] sm:$0xff]  }
  0x12   : > { %929 = vmatprep.mubr.msk.bf16.mxu1 %vm314_vm1, %v965_v5  ;;  %914 = vmatmul.mubr.msk.bf16.vlgmr.msra.gmra.mrb[0].mxu0 %vm314_vm1, %v966_v6  ;;  %v970_v10 = vld [vmem:[%s1033_s24 + $0x18] sm:$0xff]   ;;  %v972_v12 = vld [vmem:[%s1033_s24 + $0x20] sm:$0xff]   ;;  %v974_v14 = vld [vmem:[%s1033_s24 + $0x28] sm:$0xff]  }
  0x13   : > { %930 = vmatmul.mubr.msk.bf16.vlgmr.msra.gmra.mrb[0].mxu1 %vm314_vm1, %v967_v7  ;;  %917 = vmatprep.mubr.msk.bf16.mxu0 %vm314_vm1, %v968_v8  ;;  %v971_v11 = vld [vmem:[%s1033_s24 + $0x58] sm:$0xff]   ;;  %v973_v13 = vld [vmem:[%s1033_s24 + $0x60] sm:$0xff]   ;;  %v975_v15 = vld [vmem:[%s1033_s24 + $0x68] sm:$0xff]  }
  0x14   : > { %933 = vmatprep.mubr.msk.bf16.mxu1 %vm314_vm1, %v969_v9  ;;  %v976_v16 = vld [vmem:[%s1033_s24 + $0x30] sm:$0xff]   ;;  %v978_v18 = vld [vmem:[%s1033_s24 + $0x38] sm:$0xff]  }
  0x15   : > { %v977_v17 = vld [vmem:[%s1033_s24 + $0x70] sm:$0xff]   ;;  %v979_v19 = vld [vmem:[%s1033_s24 + $0x78] sm:$0xff]  }
  0x1a   : > { %918 = vmatmul.mubr.msk.bf16.gmra.mrb[4].mxu0 %vm314_vm1, %v970_v10 }
  0x1b   : > { %934 = vmatmul.mubr.msk.bf16.gmra.mrb[4].mxu1 %vm314_vm1, %v971_v11  ;;  %921 = vmatprep.mubr.msk.bf16.mxu0 %vm314_vm1, %v972_v12 }
  0x1c   : > { %937 = vmatprep.mubr.msk.bf16.mxu1 %vm314_vm1, %v973_v13 }
  0x22   : > { %922 = vmatmul.mubr.msk.bf16.gmra.mrb[8].mxu0 %vm314_vm1, %v974_v14 }
  0x23   : > { %938 = vmatmul.mubr.msk.bf16.gmra.mrb[8].mxu1 %vm314_vm1, %v975_v15  ;;  %925 = vmatprep.mubr.msk.bf16.mxu0 %vm314_vm1, %v976_v16 }
  0x24   : > { %941 = vmatprep.mubr.msk.bf16.mxu1 %vm314_vm1, %v977_v17 }
  0x2a   : > { %926 = vmatmul.mubr.msk.bf16.gmra.mrb[12].mxu0 %vm314_vm1, %v978_v18 }
  0x2b   : > { %942 = vmatmul.mubr.msk.bf16.gmra.mrb[12].mxu1 %vm314_vm1, %v979_v19 }
  0xe5   : > { %v915_v21 = vpop.f32.mrb[0].mxu0 }
  0xe6   : > { %v931_v22 = vpop.f32.mrb[0].mxu1  ;;  %v410_v23 = vadd.f32 %v915_v21, %v1070_v20  ;;  %v401_v25 = vpop.f32.mrb[1].mxu0 }
  0xe7   : > { %v474_v24 = vadd.f32 %v931_v22, %v1070_v20  ;;  %v465_v26 = vpop.f32.mrb[1].mxu1  ;;  %v402_v27 = vadd.f32 %v1070_v20, %v401_v25  ;;  %v916_v29 = vpop.f32.mrb[2].mxu0 }
  0xe8   : > { %v466_v28 = vadd.f32 %v1070_v20, %v465_v26  ;;  %v932_v30 = vpop.f32.mrb[2].mxu1  ;;  %v530_v31 = vmax.f32 %v410_v23, 0.0  ;;  %v413_v33 = vadd.f32 %v916_v29, %v1070_v20  ;;  %v404_v35 = vpop.f32.mrb[3].mxu0 }
  0xe9   : > { %v546_v32 = vmax.f32 %v474_v24, 0.0  ;;  %v477_v34 = vadd.f32 %v932_v30, %v1070_v20  ;;  %v468_v36 = vpop.f32.mrb[3].mxu1  ;;  %v528_v37 = vmax.f32 %v402_v27, 0.0  ;;  %v405_v39 = vadd.f32 %v1070_v20, %v404_v35 }
  0xea   : > { %v544_v38 = vmax.f32 %v466_v28, 0.0  ;;  %v469_v40 = vadd.f32 %v1070_v20, %v468_v36  ;;  %v858_v41 = vpack.c.bf16 %v530_v31, %v530_v31  ;;  %v531_v43 = vmax.f32 %v413_v33, 0.0 }
  0xeb   : > { %v874_v42 = vpack.c.bf16 %v546_v32, %v546_v32  ;;  %v547_v44 = vmax.f32 %v477_v34, 0.0  ;;  %v856_v45 = vpack.c.bf16 %v528_v37, %v528_v37  ;;  %v529_v47 = vmax.f32 %v405_v39, 0.0 }
  0xec   : > { %v872_v46 = vpack.c.bf16 %v544_v38, %v544_v38  ;;  %v545_v48 = vmax.f32 %v469_v40, 0.0  ;;  %691 = vst.msk [vmem:[%s1083_s29 + $0x8] sm:$0xf] %vm688_vm2, %v858_v41  ;;  %v859_v49 = vpack.c.bf16 %v531_v43, %v531_v43 }
  0xed   : > { %707 = vst.msk [vmem:[%s1083_s29 + $0x48] sm:$0xf] %vm688_vm2, %v874_v42  ;;  %v875_v50 = vpack.c.bf16 %v547_v44, %v547_v44  ;;  %689 = vst.msk [vmem:[%s1083_s29] sm:$0xf] %vm688_vm2, %v856_v45  ;;  %v857_v51 = vpack.c.bf16 %v529_v47, %v529_v47  ;;  %v919_v53 = vpop.f32.mrb[4].mxu0 }
  0xee   : > { %705 = vst.msk [vmem:[%s1083_s29 + $0x40] sm:$0xf] %vm688_vm2, %v872_v46  ;;  %v873_v52 = vpack.c.bf16 %v545_v48, %v545_v48  ;;  %v935_v54 = vpop.f32.mrb[4].mxu1  ;;  %692 = vst.msk [vmem:[%s1083_s29 + $0xc] sm:$0xf] %vm688_vm2, %v859_v49  ;;  %v426_v55 = vadd.f32 %v919_v53, %v1070_v20  ;;  %v417_v57 = vpop.f32.mrb[5].mxu0 }
  0xef   : > { %708 = vst.msk [vmem:[%s1083_s29 + $0x4c] sm:$0xf] %vm688_vm2, %v875_v50  ;;  %v490_v56 = vadd.f32 %v935_v54, %v1070_v20  ;;  %v481_v58 = vpop.f32.mrb[5].mxu1  ;;  %690 = vst.msk [vmem:[%s1083_s29 + $0x4] sm:$0xf] %vm688_vm2, %v857_v51  ;;  %v418_v59 = vadd.f32 %v1070_v20, %v417_v57  ;;  %v920_v61 = vpop.f32.mrb[6].mxu0 }
  0xf0   : > { %706 = vst.msk [vmem:[%s1083_s29 + $0x44] sm:$0xf] %vm688_vm2, %v873_v52  ;;  %v482_v60 = vadd.f32 %v1070_v20, %v481_v58  ;;  %v936_v62 = vpop.f32.mrb[6].mxu1  ;;  %v534_v63 = vmax.f32 %v426_v55, 0.0  ;;  %v429_v1 = vadd.f32 %v920_v61, %v1070_v20  ;;  %v420_v3 = vpop.f32.mrb[7].mxu0 }
  0xf1   : > { %v550_v0 = vmax.f32 %v490_v56, 0.0  ;;  %v493_v2 = vadd.f32 %v936_v62, %v1070_v20  ;;  %v484_v4 = vpop.f32.mrb[7].mxu1  ;;  %v532_v5 = vmax.f32 %v418_v59, 0.0  ;;  %v421_v7 = vadd.f32 %v1070_v20, %v420_v3 }
  0xf2   : > { %v548_v6 = vmax.f32 %v482_v60, 0.0  ;;  %v485_v8 = vadd.f32 %v1070_v20, %v484_v4  ;;  %v862_v9 = vpack.c.bf16 %v534_v63, %v534_v63  ;;  %v535_v11 = vmax.f32 %v429_v1, 0.0 }
  0xf3   : > { %v878_v10 = vpack.c.bf16 %v550_v0, %v550_v0  ;;  %v551_v12 = vmax.f32 %v493_v2, 0.0  ;;  %v860_v13 = vpack.c.bf16 %v532_v5, %v532_v5  ;;  %v533_v15 = vmax.f32 %v421_v7, 0.0 }
  0xf4   : > { %v876_v14 = vpack.c.bf16 %v548_v6, %v548_v6  ;;  %v549_v16 = vmax.f32 %v485_v8, 0.0  ;;  %695 = vst.msk [vmem:[%s1083_s29 + $0x18] sm:$0xf] %vm688_vm2, %v862_v9  ;;  %v863_v17 = vpack.c.bf16 %v535_v11, %v535_v11 }
  0xf5   : > { %711 = vst.msk [vmem:[%s1083_s29 + $0x58] sm:$0xf] %vm688_vm2, %v878_v10  ;;  %v879_v18 = vpack.c.bf16 %v551_v12, %v551_v12  ;;  %693 = vst.msk [vmem:[%s1083_s29 + $0x10] sm:$0xf] %vm688_vm2, %v860_v13  ;;  %v861_v19 = vpack.c.bf16 %v533_v15, %v533_v15  ;;  %v923_v22 = vpop.f32.mrb[8].mxu0 }
  0xf6   : > { %709 = vst.msk [vmem:[%s1083_s29 + $0x50] sm:$0xf] %vm688_vm2, %v876_v14  ;;  %v877_v21 = vpack.c.bf16 %v549_v16, %v549_v16  ;;  %v939_v23 = vpop.f32.mrb[8].mxu1  ;;  %696 = vst.msk [vmem:[%s1083_s29 + $0x1c] sm:$0xf] %vm688_vm2, %v863_v17  ;;  %v442_v24 = vadd.f32 %v923_v22, %v1070_v20  ;;  %v433_v26 = vpop.f32.mrb[9].mxu0 }
  0xf7   : > { %712 = vst.msk [vmem:[%s1083_s29 + $0x5c] sm:$0xf] %vm688_vm2, %v879_v18  ;;  %v506_v25 = vadd.f32 %v939_v23, %v1070_v20  ;;  %v497_v27 = vpop.f32.mrb[9].mxu1  ;;  %694 = vst.msk [vmem:[%s1083_s29 + $0x14] sm:$0xf] %vm688_vm2, %v861_v19  ;;  %v434_v28 = vadd.f32 %v1070_v20, %v433_v26  ;;  %v924_v30 = vpop.f32.mrb[10].mxu0 }
  0xf8   : > { %710 = vst.msk [vmem:[%s1083_s29 + $0x54] sm:$0xf] %vm688_vm2, %v877_v21  ;;  %v498_v29 = vadd.f32 %v1070_v20, %v497_v27  ;;  %v940_v31 = vpop.f32.mrb[10].mxu1  ;;  %v538_v32 = vmax.f32 %v442_v24, 0.0  ;;  %v445_v34 = vadd.f32 %v924_v30, %v1070_v20  ;;  %v436_v36 = vpop.f32.mrb[11].mxu0 }
  0xf9   : > { %v554_v33 = vmax.f32 %v506_v25, 0.0  ;;  %v509_v35 = vadd.f32 %v940_v31, %v1070_v20  ;;  %v500_v37 = vpop.f32.mrb[11].mxu1  ;;  %v536_v38 = vmax.f32 %v434_v28, 0.0  ;;  %v437_v40 = vadd.f32 %v1070_v20, %v436_v36 }
  0xfa   : > { %v552_v39 = vmax.f32 %v498_v29, 0.0  ;;  %v501_v41 = vadd.f32 %v1070_v20, %v500_v37  ;;  %v866_v42 = vpack.c.bf16 %v538_v32, %v538_v32  ;;  %v539_v44 = vmax.f32 %v445_v34, 0.0 }
  0xfb   : > { %v882_v43 = vpack.c.bf16 %v554_v33, %v554_v33  ;;  %v555_v45 = vmax.f32 %v509_v35, 0.0  ;;  %v864_v46 = vpack.c.bf16 %v536_v38, %v536_v38  ;;  %v537_v48 = vmax.f32 %v437_v40, 0.0 }
  0xfc   : > { %v880_v47 = vpack.c.bf16 %v552_v39, %v552_v39  ;;  %v553_v49 = vmax.f32 %v501_v41, 0.0  ;;  %699 = vst.msk [vmem:[%s1083_s29 + $0x28] sm:$0xf] %vm688_vm2, %v866_v42  ;;  %v867_v50 = vpack.c.bf16 %v539_v44, %v539_v44 }
  0xfd   : > { %715 = vst.msk [vmem:[%s1083_s29 + $0x68] sm:$0xf] %vm688_vm2, %v882_v43  ;;  %v883_v51 = vpack.c.bf16 %v555_v45, %v555_v45  ;;  %697 = vst.msk [vmem:[%s1083_s29 + $0x20] sm:$0xf] %vm688_vm2, %v864_v46  ;;  %v865_v52 = vpack.c.bf16 %v537_v48, %v537_v48  ;;  %v927_v54 = vpop.f32.mrb[12].mxu0 }
  0xfe   : > { %713 = vst.msk [vmem:[%s1083_s29 + $0x60] sm:$0xf] %vm688_vm2, %v880_v47  ;;  %v881_v53 = vpack.c.bf16 %v553_v49, %v553_v49  ;;  %v943_v55 = vpop.f32.mrb[12].mxu1  ;;  %700 = vst.msk [vmem:[%s1083_s29 + $0x2c] sm:$0xf] %vm688_vm2, %v867_v50  ;;  %v458_v56 = vadd.f32 %v927_v54, %v1070_v20  ;;  %v449_v58 = vpop.f32.mrb[13].mxu0 }
  0xff   : > { %716 = vst.msk [vmem:[%s1083_s29 + $0x6c] sm:$0xf] %vm688_vm2, %v883_v51  ;;  %v522_v57 = vadd.f32 %v943_v55, %v1070_v20  ;;  %v513_v59 = vpop.f32.mrb[13].mxu1  ;;  %698 = vst.msk [vmem:[%s1083_s29 + $0x24] sm:$0xf] %vm688_vm2, %v865_v52  ;;  %v450_v60 = vadd.f32 %v1070_v20, %v449_v58  ;;  %v928_v62 = vpop.f32.mrb[14].mxu0 }
 0x100   : > { %714 = vst.msk [vmem:[%s1083_s29 + $0x64] sm:$0xf] %vm688_vm2, %v881_v53  ;;  %v514_v61 = vadd.f32 %v1070_v20, %v513_v59  ;;  %v944_v63 = vpop.f32.mrb[14].mxu1  ;;  %v542_v0 = vmax.f32 %v458_v56, 0.0  ;;  %v461_v2 = vadd.f32 %v928_v62, %v1070_v20  ;;  %v452_v4 = vpop.f32.mrb[15].mxu0 }
 0x101   : > { %v558_v1 = vmax.f32 %v522_v57, 0.0  ;;  %v525_v3 = vadd.f32 %v944_v63, %v1070_v20  ;;  %v516_v5 = vpop.f32.mrb[15].mxu1  ;;  %v540_v6 = vmax.f32 %v450_v60, 0.0  ;;  %v453_v8 = vadd.f32 %v1070_v20, %v452_v4 }
 0x102   : > { %v556_v7 = vmax.f32 %v514_v61, 0.0  ;;  %v517_v9 = vadd.f32 %v1070_v20, %v516_v5  ;;  %v870_v10 = vpack.c.bf16 %v542_v0, %v542_v0  ;;  %v543_v12 = vmax.f32 %v461_v2, 0.0 }
 0x103   : > { %v886_v11 = vpack.c.bf16 %v558_v1, %v558_v1  ;;  %v559_v13 = vmax.f32 %v525_v3, 0.0  ;;  %v868_v14 = vpack.c.bf16 %v540_v6, %v540_v6  ;;  %v541_v16 = vmax.f32 %v453_v8, 0.0 }
 0x104   : > { %v884_v15 = vpack.c.bf16 %v556_v7, %v556_v7  ;;  %v557_v17 = vmax.f32 %v517_v9, 0.0  ;;  %703 = vst.msk [vmem:[%s1083_s29 + $0x38] sm:$0xf] %vm688_vm2, %v870_v10  ;;  %v871_v18 = vpack.c.bf16 %v543_v12, %v543_v12 }
 0x105   : > { %719 = vst.msk [vmem:[%s1083_s29 + $0x78] sm:$0xf] %vm688_vm2, %v886_v11  ;;  %v887_v19 = vpack.c.bf16 %v559_v13, %v559_v13  ;;  %701 = vst.msk [vmem:[%s1083_s29 + $0x30] sm:$0xf] %vm688_vm2, %v868_v14  ;;  %v869_v20 = vpack.c.bf16 %v541_v16, %v541_v16 }
 0x106   : > { %717 = vst.msk [vmem:[%s1083_s29 + $0x70] sm:$0xf] %vm688_vm2, %v884_v15  ;;  %v885_v21 = vpack.c.bf16 %v557_v17, %v557_v17  ;;  %704 = vst.msk [vmem:[%s1083_s29 + $0x3c] sm:$0xf] %vm688_vm2, %v871_v18 }
 0x107   : > { %720 = vst.msk [vmem:[%s1083_s29 + $0x7c] sm:$0xf] %vm688_vm2, %v887_v19  ;;  %702 = vst.msk [vmem:[%s1083_s29 + $0x34] sm:$0xf] %vm688_vm2, %v869_v20 }
 0x108   : > { %718 = vst.msk [vmem:[%s1083_s29 + $0x74] sm:$0xf] %vm688_vm2, %v885_v21 }
 0x109 PF: > { %s13_s12 = sadd.s32 1, %s986_s12  }
 0x10a   : > { %p10_p4 = scmp.ge.s32.totalorder %s13_s12, 4  }
 0x10c   :  { %12 = sbr.rel (!%p10_p4) target bundleno = 1 (0x1), region = 62 }

// kernel: residual_block_forward.3
= control target key start
LH: loop header
LB: loop body
LE: loop exit
PB: predicated region body
PF: predicated region fallthrough
CT: control target
= control target key end

     0   :  { %s1059_s15 = smov 0   ;;  %s1251_s0 = inlined_call_operand.vmem [shape: bf16[512,36], index: 0, kind: input, shape index: {}]   ;;  %s1252_s1 = inlined_call_operand.vmem [shape: bf16[36,4], index: 1, kind: input, shape index: {}]   ;;  %s1253_s2 = inlined_call_operand.vmem [shape: f32[1,4], index: 2, kind: input, shape index: {}]   ;;  %s1254_s3 = inlined_call_operand.vmem [shape: bf16[512,4], index: 3, kind: input, shape index: {}]   ;;  %s1255_s4 = inlined_call_operand.vmem [shape: f32[512,4], index: 4, kind: output, shape index: {}]  }
   0x1 LB: > { %s806_s16 = sadd.s32 4294967295, %s1032_s15   ;;  %p810_p0 = scmp.ge.s32.totalorder %s1032_s15, 1  ;;  %s1032_s15 = sphi %s1059_s15, %s14_s15  }
   0x2   : > { %p174_p1 = scmp.lt.s32.totalorder %s1032_s15, 3 }
   0x4   : > { %p175_p2 = pnand %p810_p0, %p174_p1 }
   0x5   : > { %v1007_v0 = vld [vmem:[%s1252_s1] sm:$0xff] (!%p175_p2)   ;;  %v1008_v1 = vld [vmem:[%s1252_s1 + $0x8] sm:$0xff] (!%p175_p2)   ;;  %s811_s21 = sshll.u32 (!%p175_p2), %s806_s16, 5  ;;  %v1009_v2 = vld [vmem:[%s1252_s1 + $0x10] ss:$0 sps:$4 sm:$0x33] (!%p175_p2)  }
   0x6   : > { %178 = sbr.rel (%p175_p2) target bundleno = 265 (0x109), region = 36  ;;  %953 = vmatprep.subr.bf16.mxu0 (!%p175_p2), %v1007_v0  ;;  %991 = vmatprep.subr.bf16.mxu1 (!%p175_p2), %v1007_v0  ;;  %p206_p3 = scmp.lt.s32.totalorder (!%p175_p2), %s811_s21, 63  ;;  %vm412_vm0 = vcmask (!%p175_p2), 1041408   ;;  %vm363_vm1 = vcmask (!%p175_p2), 293888   ;;  %v1132_v24 = vld [vmem:[%s1253_s2] ss:$0 sm:$0xff] (!%p175_p2) }
   0x7   : > { %954 = vmatpush3.bf16.msra.mxu0 (!%p175_p2), %v1007_v0  ;;  %994 = vmatpush3.bf16.msra.mxu1 (!%p175_p2), %v1007_v0  ;;  %v414_v3 = vsel (!%p175_p2), %vm412_vm0, %v1009_v2, 0  ;;  %vm705_vm2 = vcmask (!%p175_p2), 31744  }
   0x8   : > { %955 = vmatprep.subr.bf16.mxu0 (!%p175_p2), %v1008_v1  ;;  %992 = vmatprep.subr.bf16.mxu1 (!%p175_p2), %v1008_v1 }
   0xb   : > { %956 = vmatpush3.bf16.msra.mxu0 (!%p175_p2), %v1008_v1  ;;  %995 = vmatpush3.bf16.msra.mxu1 (!%p175_p2), %v1008_v1 }
   0xc   : > { %997 = vmatprep.subr.msk.bf16.mxu0 (!%p175_p2), %vm412_vm0, %v1009_v2  ;;  %998 = vmatprep.subr.msk.bf16.mxu1 (!%p175_p2), %vm412_vm0, %v1009_v2 }
   0xd   : > { %s1257_s21 = smov (!%p206_p3, %s811_s21), 63 }
   0xe   : > { %s812_s24 = sshll.u32 %s1257_s21, 2  ;;  %s816_s7 = sshll.u32 %s1257_s21, 3 }
   0xf   : > { %s1084_s27 = scalar_lea.vmem %s1251_s0, %s812_s24  ;;  %958 = vmatpush3.bf16.msra.mxu0 %v414_v3  ;;  %996 = vmatpush3.bf16.msra.mxu1 %v414_v3  ;;  %s1123_s30 = scalar_lea.vmem %s1254_s3, %s812_s24 }
  0x10   : > { %v1010_v4 = vld [vmem:[%s1084_s27] sm:$0xff]   ;;  %v1012_v6 = vld [vmem:[%s1084_s27 + $0x8] sm:$0xff]   ;;  %v1014_v8 = vld [vmem:[%s1084_s27 + $0x10] sm:$0xff]   ;;  %s1144_s10 = scalar_lea.vmem %s1255_s4, %s816_s7 }
  0x11   : > { %v1011_v5 = vld [vmem:[%s1084_s27 + $0x40] sm:$0xff]   ;;  %959 = vmatprep.mubr.msk.bf16.mxu0 %vm363_vm1, %v1010_v4  ;;  %v1013_v7 = vld [vmem:[%s1084_s27 + $0x48] sm:$0xff]   ;;  %v1015_v9 = vld [vmem:[%s1084_s27 + $0x50] sm:$0xff]  }
  0x12   : > { %975 = vmatprep.mubr.msk.bf16.mxu1 %vm363_vm1, %v1011_v5  ;;  %960 = vmatmul.mubr.msk.bf16.vlgmr.msra.gmra.mrb[0].mxu0 %vm363_vm1, %v1012_v6  ;;  %v1016_v10 = vld [vmem:[%s1084_s27 + $0x18] sm:$0xff]   ;;  %v1018_v12 = vld [vmem:[%s1084_s27 + $0x20] sm:$0xff]   ;;  %v1020_v14 = vld [vmem:[%s1084_s27 + $0x28] sm:$0xff]  }
  0x13   : > { %976 = vmatmul.mubr.msk.bf16.vlgmr.msra.gmra.mrb[0].mxu1 %vm363_vm1, %v1013_v7  ;;  %963 = vmatprep.mubr.msk.bf16.mxu0 %vm363_vm1, %v1014_v8  ;;  %v1017_v11 = vld [vmem:[%s1084_s27 + $0x58] sm:$0xff]   ;;  %v1019_v13 = vld [vmem:[%s1084_s27 + $0x60] sm:$0xff]   ;;  %v1021_v15 = vld [vmem:[%s1084_s27 + $0x68] sm:$0xff]  }
  0x14   : > { %979 = vmatprep.mubr.msk.bf16.mxu1 %vm363_vm1, %v1015_v9  ;;  %v1022_v16 = vld [vmem:[%s1084_s27 + $0x30] sm:$0xff]   ;;  %v1024_v18 = vld [vmem:[%s1084_s27 + $0x38] sm:$0xff]   ;;  %v919_v20 = vld [vmem:[%s1123_s30 + $0x8] sm:$0xff]  }
  0x15   : > { %v1023_v17 = vld [vmem:[%s1084_s27 + $0x70] sm:$0xff]   ;;  %v1025_v19 = vld [vmem:[%s1084_s27 + $0x78] sm:$0xff]   ;;  %v927_v21 = vld [vmem:[%s1123_s30 + $0x48] sm:$0xff]   ;;  %v861_v25 = vunpack.c.l.bf16 %v919_v20  ;;  %v862_v31 = vunpack.c.h.bf16 %v919_v20 }
  0x16   : > { %v856_v22 = vld [vmem:[%s1123_s30] sm:$0xff]   ;;  %v893_v26 = vunpack.c.l.bf16 %v927_v21  ;;  %v894_v36 = vunpack.c.h.bf16 %v927_v21  ;;  %v921_v53 = vld [vmem:[%s1123_s30 + $0x18] sm:$0xff]   ;;  %v920_v59 = vld [vmem:[%s1123_s30 + $0x10] sm:$0xff]  }
  0x17   : > { %v926_v23 = vld [vmem:[%s1123_s30 + $0x40] sm:$0xff]   ;;  %v857_v29 = vunpack.c.l.bf16 %v856_v22  ;;  %v858_v37 = vunpack.c.h.bf16 %v856_v22  ;;  %v929_v54 = vld [vmem:[%s1123_s30 + $0x58] sm:$0xff]   ;;  %v928_v60 = vld [vmem:[%s1123_s30 + $0x50] sm:$0xff]   ;;  %v869_v3 = vunpack.c.l.bf16 %v921_v53  ;;  %v865_v9 = vunpack.c.l.bf16 %v920_v59 }
  0x18   : > { %v889_v30 = vunpack.c.l.bf16 %v926_v23  ;;  %v890_v42 = vunpack.c.h.bf16 %v926_v23  ;;  %v901_v4 = vunpack.c.l.bf16 %v929_v54  ;;  %v866_v21 = vunpack.c.h.bf16 %v920_v59 }
  0x19   : > { %v898_v22 = vunpack.c.h.bf16 %v928_v60 }
  0x1a   : > { %964 = vmatmul.mubr.msk.bf16.gmra.mrb[4].mxu0 %vm363_vm1, %v1016_v10  ;;  %v897_v10 = vunpack.c.l.bf16 %v928_v60 }
  0x1b   : > { %980 = vmatmul.mubr.msk.bf16.gmra.mrb[4].mxu1 %vm363_vm1, %v1017_v11  ;;  %967 = vmatprep.mubr.msk.bf16.mxu0 %vm363_vm1, %v1018_v12 }
  0x1c   : > { %983 = vmatprep.mubr.msk.bf16.mxu1 %vm363_vm1, %v1019_v13 }
  0x22   : > { %968 = vmatmul.mubr.msk.bf16.gmra.mrb[8].mxu0 %vm363_vm1, %v1020_v14 }
  0x23   : > { %984 = vmatmul.mubr.msk.bf16.gmra.mrb[8].mxu1 %vm363_vm1, %v1021_v15  ;;  %971 = vmatprep.mubr.msk.bf16.mxu0 %vm363_vm1, %v1022_v16  ;;  %v870_v15 = vunpack.c.h.bf16 %v921_v53  ;;  %v902_v16 = vunpack.c.h.bf16 %v929_v54 }
  0x24   : > { %987 = vmatprep.mubr.msk.bf16.mxu1 %vm363_vm1, %v1023_v17 }
  0x2a   : > { %972 = vmatmul.mubr.msk.bf16.gmra.mrb[12].mxu0 %vm363_vm1, %v1024_v18 }
  0x2b   : > { %988 = vmatmul.mubr.msk.bf16.gmra.mrb[12].mxu1 %vm363_vm1, %v1025_v19 }
  0xe5   : > { %v961_v27 = vpop.f32.mrb[0].mxu0 }
  0xe6   : > { %v977_v28 = vpop.f32.mrb[0].mxu1  ;;  %v459_v32 = vadd.f32 %v961_v27, %v1132_v24  ;;  %v450_v34 = vpop.f32.mrb[1].mxu0 }
  0xe7   : > { %v523_v33 = vadd.f32 %v977_v28, %v1132_v24  ;;  %v514_v35 = vpop.f32.mrb[1].mxu1  ;;  %v451_v38 = vadd.f32 %v1132_v24, %v450_v34  ;;  %v962_v40 = vpop.f32.mrb[2].mxu0  ;;  %v923_v34 = vld [vmem:[%s1123_s30 + $0x28] sm:$0xff]  }
  0xe8   : > { %v515_v39 = vadd.f32 %v1132_v24, %v514_v35  ;;  %v978_v41 = vpop.f32.mrb[2].mxu1  ;;  %v643_v43 = vadd.f32 %v861_v25, %v459_v32  ;;  %v462_v45 = vadd.f32 %v962_v40, %v1132_v24  ;;  %v453_v47 = vpop.f32.mrb[3].mxu0  ;;  %v931_v35 = vld [vmem:[%s1123_s30 + $0x68] sm:$0xff]   ;;  %v922_v40 = vld [vmem:[%s1123_s30 + $0x20] sm:$0xff]   ;;  %v878_v60 = vunpack.c.h.bf16 %v923_v34 }
  0xe9   : > { %v659_v44 = vadd.f32 %v893_v26, %v523_v33  ;;  %v526_v46 = vadd.f32 %v978_v41, %v1132_v24  ;;  %v517_v48 = vpop.f32.mrb[3].mxu1  ;;  %v641_v49 = vadd.f32 %v857_v29, %v451_v38  ;;  %v454_v51 = vadd.f32 %v1132_v24, %v453_v47  ;;  %v930_v41 = vld [vmem:[%s1123_s30 + $0x60] sm:$0xff]  }
  0xea   : > { %v657_v50 = vadd.f32 %v889_v30, %v515_v39  ;;  %v518_v52 = vadd.f32 %v1132_v24, %v517_v48  ;;  %v675_v55 = vmax.f32 %v643_v43, 0.0  ;;  %v644_v57 = vadd.f32 %v862_v31, %v462_v45 }
  0xeb   : > { %v691_v56 = vmax.f32 %v659_v44, 0.0  ;;  %v660_v58 = vadd.f32 %v894_v36, %v526_v46  ;;  %v673_v61 = vmax.f32 %v641_v49, 0.0  ;;  %v642_v63 = vadd.f32 %v858_v37, %v454_v51 }
  0xec   : > { %v689_v62 = vmax.f32 %v657_v50, 0.0  ;;  %v658_v0 = vadd.f32 %v890_v42, %v518_v52  ;;  %708 = vst.msk [vmem:[%s1144_s10 + $0x10] sm:$0xff] %vm705_vm2, %v675_v55  ;;  %v676_v1 = vmax.f32 %v644_v57, 0.0  ;;  %v877_v48 = vunpack.c.l.bf16 %v923_v34 }
  0xed   : > { %724 = vst.msk [vmem:[%s1144_s10 + $0x90] sm:$0xff] %vm705_vm2, %v691_v56  ;;  %v692_v2 = vmax.f32 %v660_v58, 0.0  ;;  %706 = vst.msk [vmem:[%s1144_s10] sm:$0xff] %vm705_vm2, %v673_v61  ;;  %v674_v5 = vmax.f32 %v642_v63, 0.0  ;;  %v965_v7 = vpop.f32.mrb[4].mxu0  ;;  %v909_v49 = vunpack.c.l.bf16 %v931_v35  ;;  %v873_v54 = vunpack.c.l.bf16 %v922_v40 }
  0xee   : > { %722 = vst.msk [vmem:[%s1144_s10 + $0x80] sm:$0xff] %vm705_vm2, %v689_v62  ;;  %v690_v6 = vmax.f32 %v658_v0, 0.0  ;;  %v981_v8 = vpop.f32.mrb[4].mxu1  ;;  %709 = vst.msk [vmem:[%s1144_s10 + $0x18] sm:$0xff] %vm705_vm2, %v676_v1  ;;  %v475_v11 = vadd.f32 %v965_v7, %v1132_v24  ;;  %v466_v13 = vpop.f32.mrb[5].mxu0  ;;  %v905_v55 = vunpack.c.l.bf16 %v930_v41  ;;  %v910_v61 = vunpack.c.h.bf16 %v931_v35 }
  0xef   : > { %725 = vst.msk [vmem:[%s1144_s10 + $0x98] sm:$0xff] %vm705_vm2, %v692_v2  ;;  %v539_v12 = vadd.f32 %v981_v8, %v1132_v24  ;;  %v530_v14 = vpop.f32.mrb[5].mxu1  ;;  %707 = vst.msk [vmem:[%s1144_s10 + $0x8] sm:$0xff] %vm705_vm2, %v674_v5  ;;  %v467_v17 = vadd.f32 %v1132_v24, %v466_v13  ;;  %v966_v19 = vpop.f32.mrb[6].mxu0  ;;  %v874_v2 = vunpack.c.h.bf16 %v922_v40 }
  0xf0   : > { %723 = vst.msk [vmem:[%s1144_s10 + $0x88] sm:$0xff] %vm705_vm2, %v690_v6  ;;  %v531_v18 = vadd.f32 %v1132_v24, %v530_v14  ;;  %v982_v20 = vpop.f32.mrb[6].mxu1  ;;  %v647_v23 = vadd.f32 %v869_v3, %v475_v11  ;;  %v478_v26 = vadd.f32 %v966_v19, %v1132_v24  ;;  %v469_v28 = vpop.f32.mrb[7].mxu0  ;;  %v906_v3 = vunpack.c.h.bf16 %v930_v41  ;;  %v925_v14 = vld [vmem:[%s1123_s30 + $0x38] sm:$0xff]  }
  0xf1   : > { %v663_v25 = vadd.f32 %v901_v4, %v539_v12  ;;  %v542_v27 = vadd.f32 %v982_v20, %v1132_v24  ;;  %v533_v29 = vpop.f32.mrb[7].mxu1  ;;  %v645_v30 = vadd.f32 %v865_v9, %v467_v17  ;;  %v470_v32 = vadd.f32 %v1132_v24, %v469_v28  ;;  %v924_v20 = vld [vmem:[%s1123_s30 + $0x30] sm:$0xff]  }
  0xf2   : > { %v661_v31 = vadd.f32 %v897_v10, %v531_v18  ;;  %v534_v33 = vadd.f32 %v1132_v24, %v533_v29  ;;  %v679_v36 = vmax.f32 %v647_v23, 0.0  ;;  %v648_v38 = vadd.f32 %v870_v15, %v478_v26  ;;  %v933_v15 = vld [vmem:[%s1123_s30 + $0x78] sm:$0xff]  }
  0xf3   : > { %v695_v37 = vmax.f32 %v663_v25, 0.0  ;;  %v664_v39 = vadd.f32 %v902_v16, %v542_v27  ;;  %v677_v42 = vmax.f32 %v645_v30, 0.0  ;;  %v646_v44 = vadd.f32 %v866_v21, %v470_v32  ;;  %v932_v21 = vld [vmem:[%s1123_s30 + $0x70] sm:$0xff]  }
  0xf4   : > { %v693_v43 = vmax.f32 %v661_v31, 0.0  ;;  %v662_v45 = vadd.f32 %v898_v22, %v534_v33  ;;  %712 = vst.msk [vmem:[%s1144_s10 + $0x30] sm:$0xff] %vm705_vm2, %v679_v36  ;;  %v680_v46 = vmax.f32 %v648_v38, 0.0  ;;  %v885_v29 = vunpack.c.l.bf16 %v925_v14 }
  0xf5   : > { %728 = vst.msk [vmem:[%s1144_s10 + $0xb0] sm:$0xff] %vm705_vm2, %v695_v37  ;;  %v696_v47 = vmax.f32 %v664_v39, 0.0  ;;  %710 = vst.msk [vmem:[%s1144_s10 + $0x20] sm:$0xff] %vm705_vm2, %v677_v42  ;;  %v678_v50 = vmax.f32 %v646_v44, 0.0  ;;  %v969_v52 = vpop.f32.mrb[8].mxu0  ;;  %v917_v30 = vunpack.c.l.bf16 %v933_v15  ;;  %v881_v35 = vunpack.c.l.bf16 %v924_v20 }
  0xf6   : > { %726 = vst.msk [vmem:[%s1144_s10 + $0xa0] sm:$0xff] %vm705_vm2, %v693_v43  ;;  %v694_v51 = vmax.f32 %v662_v45, 0.0  ;;  %v985_v53 = vpop.f32.mrb[8].mxu1  ;;  %713 = vst.msk [vmem:[%s1144_s10 + $0x38] sm:$0xff] %vm705_vm2, %v680_v46  ;;  %v491_v56 = vadd.f32 %v969_v52, %v1132_v24  ;;  %v482_v58 = vpop.f32.mrb[9].mxu0  ;;  %v913_v36 = vunpack.c.l.bf16 %v932_v21  ;;  %v886_v41 = vunpack.c.h.bf16 %v925_v14 }
  0xf7   : > { %729 = vst.msk [vmem:[%s1144_s10 + $0xb8] sm:$0xff] %vm705_vm2, %v696_v47  ;;  %v555_v57 = vadd.f32 %v985_v53, %v1132_v24  ;;  %v546_v59 = vpop.f32.mrb[9].mxu1  ;;  %711 = vst.msk [vmem:[%s1144_s10 + $0x28] sm:$0xff] %vm705_vm2, %v678_v50  ;;  %v483_v62 = vadd.f32 %v1132_v24, %v482_v58  ;;  %v970_v0 = vpop.f32.mrb[10].mxu0  ;;  %v918_v42 = vunpack.c.h.bf16 %v933_v15  ;;  %v882_v47 = vunpack.c.h.bf16 %v924_v20 }
  0xf8   : > { %727 = vst.msk [vmem:[%s1144_s10 + $0xa8] sm:$0xff] %vm705_vm2, %v694_v51  ;;  %v547_v63 = vadd.f32 %v1132_v24, %v546_v59  ;;  %v986_v1 = vpop.f32.mrb[10].mxu1  ;;  %v651_v4 = vadd.f32 %v877_v48, %v491_v56  ;;  %v494_v6 = vadd.f32 %v970_v0, %v1132_v24  ;;  %v485_v8 = vpop.f32.mrb[11].mxu0  ;;  %v914_v48 = vunpack.c.h.bf16 %v932_v21 }
  0xf9   : > { %v667_v5 = vadd.f32 %v909_v49, %v555_v57  ;;  %v558_v7 = vadd.f32 %v986_v1, %v1132_v24  ;;  %v549_v9 = vpop.f32.mrb[11].mxu1  ;;  %v649_v10 = vadd.f32 %v873_v54, %v483_v62  ;;  %v486_v12 = vadd.f32 %v1132_v24, %v485_v8 }
  0xfa   : > { %v665_v11 = vadd.f32 %v905_v55, %v547_v63  ;;  %v550_v13 = vadd.f32 %v1132_v24, %v549_v9  ;;  %v683_v16 = vmax.f32 %v651_v4, 0.0  ;;  %v652_v18 = vadd.f32 %v878_v60, %v494_v6 }
  0xfb   : > { %v699_v17 = vmax.f32 %v667_v5, 0.0  ;;  %v668_v19 = vadd.f32 %v910_v61, %v558_v7  ;;  %v681_v22 = vmax.f32 %v649_v10, 0.0  ;;  %v650_v25 = vadd.f32 %v874_v2, %v486_v12 }
  0xfc   : > { %v697_v23 = vmax.f32 %v665_v11, 0.0  ;;  %v666_v26 = vadd.f32 %v906_v3, %v550_v13  ;;  %716 = vst.msk [vmem:[%s1144_s10 + $0x50] sm:$0xff] %vm705_vm2, %v683_v16  ;;  %v684_v27 = vmax.f32 %v652_v18, 0.0 }
  0xfd   : > { %732 = vst.msk [vmem:[%s1144_s10 + $0xd0] sm:$0xff] %vm705_vm2, %v699_v17  ;;  %v700_v28 = vmax.f32 %v668_v19, 0.0  ;;  %714 = vst.msk [vmem:[%s1144_s10 + $0x40] sm:$0xff] %vm705_vm2, %v681_v22  ;;  %v682_v31 = vmax.f32 %v650_v25, 0.0  ;;  %v973_v33 = vpop.f32.mrb[12].mxu0 }
  0xfe   : > { %730 = vst.msk [vmem:[%s1144_s10 + $0xc0] sm:$0xff] %vm705_vm2, %v697_v23  ;;  %v698_v32 = vmax.f32 %v666_v26, 0.0  ;;  %v989_v34 = vpop.f32.mrb[12].mxu1  ;;  %717 = vst.msk [vmem:[%s1144_s10 + $0x58] sm:$0xff] %vm705_vm2, %v684_v27  ;;  %v507_v37 = vadd.f32 %v973_v33, %v1132_v24  ;;  %v498_v39 = vpop.f32.mrb[13].mxu0 }
  0xff   : > { %733 = vst.msk [vmem:[%s1144_s10 + $0xd8] sm:$0xff] %vm705_vm2, %v700_v28  ;;  %v571_v38 = vadd.f32 %v989_v34, %v1132_v24  ;;  %v562_v40 = vpop.f32.mrb[13].mxu1  ;;  %715 = vst.msk [vmem:[%s1144_s10 + $0x48] sm:$0xff] %vm705_vm2, %v682_v31  ;;  %v499_v43 = vadd.f32 %v1132_v24, %v498_v39  ;;  %v974_v45 = vpop.f32.mrb[14].mxu0 }
 0x100   : > { %731 = vst.msk [vmem:[%s1144_s10 + $0xc8] sm:$0xff] %vm705_vm2, %v698_v32  ;;  %v563_v44 = vadd.f32 %v1132_v24, %v562_v40  ;;  %v990_v46 = vpop.f32.mrb[14].mxu1  ;;  %v655_v49 = vadd.f32 %v885_v29, %v507_v37  ;;  %v510_v51 = vadd.f32 %v974_v45, %v1132_v24  ;;  %v501_v53 = vpop.f32.mrb[15].mxu0 }
 0x101   : > { %v671_v50 = vadd.f32 %v917_v30, %v571_v38  ;;  %v574_v52 = vadd.f32 %v990_v46, %v1132_v24  ;;  %v565_v54 = vpop.f32.mrb[15].mxu1  ;;  %v653_v55 = vadd.f32 %v881_v35, %v499_v43  ;;  %v502_v57 = vadd.f32 %v1132_v24, %v501_v53 }
 0x102   : > { %v669_v56 = vadd.f32 %v913_v36, %v563_v44  ;;  %v566_v58 = vadd.f32 %v1132_v24, %v565_v54  ;;  %v687_v59 = vmax.f32 %v655_v49, 0.0  ;;  %v656_v61 = vadd.f32 %v886_v41, %v510_v51 }
 0x103   : > { %v703_v60 = vmax.f32 %v671_v50, 0.0  ;;  %v672_v62 = vadd.f32 %v918_v42, %v574_v52  ;;  %v685_v63 = vmax.f32 %v653_v55, 0.0  ;;  %v654_v1 = vadd.f32 %v882_v47, %v502_v57 }
 0x104   : > { %v701_v0 = vmax.f32 %v669_v56, 0.0  ;;  %v670_v2 = vadd.f32 %v914_v48, %v566_v58  ;;  %720 = vst.msk [vmem:[%s1144_s10 + $0x70] sm:$0xff] %vm705_vm2, %v687_v59  ;;  %v688_v3 = vmax.f32 %v656_v61, 0.0 }
 0x105   : > { %736 = vst.msk [vmem:[%s1144_s10 + $0xf0] sm:$0xff] %vm705_vm2, %v703_v60  ;;  %v704_v4 = vmax.f32 %v672_v62, 0.0  ;;  %718 = vst.msk [vmem:[%s1144_s10 + $0x60] sm:$0xff] %vm705_vm2, %v685_v63  ;;  %v686_v24 = vmax.f32 %v654_v1, 0.0 }
 0x106   : > { %734 = vst.msk [vmem:[%s1144_s10 + $0xe0] sm:$0xff] %vm705_vm2, %v701_v0  ;;  %v702_v5 = vmax.f32 %v670_v2, 0.0  ;;  %721 = vst.msk [vmem:[%s1144_s10 + $0x78] sm:$0xff] %vm705_vm2, %v688_v3 }
 0x107   : > { %737 = vst.msk [vmem:[%s1144_s10 + $0xf8] sm:$0xff] %vm705_vm2, %v704_v4  ;;  %719 = vst.msk [vmem:[%s1144_s10 + $0x68] sm:$0xff] %vm705_vm2, %v686_v24 }
 0x108   : > { %735 = vst.msk [vmem:[%s1144_s10 + $0xe8] sm:$0xff] %vm705_vm2, %v702_v5 }
 0x109 PF: > { %s14_s15 = sadd.s32 1, %s1032_s15  }
 0x10a   : > { %p11_p4 = scmp.ge.s32.totalorder %s14_s15, 4  }
 0x10c   :  { %13 = sbr.rel (!%p11_p4) target bundleno = 1 (0x1), region = 69 }

</bundles_post_ra>
